<compile_context>
chip_gen: v5e
topology: v5e:2x2
jax: 0.10.0
libtpu: 0.0.40
codegen_flags: <defaults>
</compile_context>

<pallas_src>
import functools

import jax
import jax.numpy as jnp
from jax.experimental import pallas as pl
from jax.experimental.pallas import tpu as pltpu

_EPS = 1e-5  # torch.nn.InstanceNorm2d default


def _cdiv(a, b):
    return -(-a // b)


# ---------------------------------------------------------------------------
# Fused kernel: conv taps + InstanceNorm2d + optional ReLU for one sample
# ---------------------------------------------------------------------------
def _fused_block_kernel(x_ref, w_ref, b_ref, o_ref, *, plan, total_px, eps, relu):
    """x_ref: [1, R, Wc, Cin] bf16 (phase-decomposed / zero-padded input)
       w_ref: [KK, Cin, Cout] bf16 (one [Cin, Cout] matrix per kernel tap)
       b_ref: [1, Cout]       f32
       o_ref: [1, total_px, Cout] f32 (output phases stacked, flat pixels)
       plan : static tuple of (out_row0, Q, Qw, ((row0, col0, tap_idx), ...))
    """
    cout = w_ref.shape[-1]
    bias = b_ref[...]                                   # [1, Cout] f32

    # ---- convolution: accumulate per-tap bf16 MXU dots into f32 ------------
    phase_acc = []
    sums = jnp.zeros((1, cout), jnp.float32)
    for (row0, q, qw, taps) in plan:
        acc = jnp.zeros((q * qw, cout), jnp.float32)
        for (r0, c0, t) in taps:
            a = x_ref[0, r0:r0 + q, c0:c0 + qw, :].reshape(q * qw, -1)
            acc = acc + jnp.dot(a, w_ref[t], preferred_element_type=jnp.float32)
        acc = acc + bias
        sums = sums + jnp.sum(acc, axis=0, keepdims=True)
        phase_acc.append(acc)

    # ---- InstanceNorm2d (biased variance, centred two-pass) -----------------
    inv_n = 1.0 / float(total_px)
    mean = sums * inv_n
    var = jnp.zeros((1, cout), jnp.float32)
    for acc in phase_acc:
        d = acc - mean
        var = var + jnp.sum(d * d, axis=0, keepdims=True)
    scale = jax.lax.rsqrt(var * inv_n + eps)            # EUP rsqrt
    shift = -mean * scale

    # ---- affine + activation epilogue, flat contiguous stores ---------------
    for (row0, q, qw, _), acc in zip(plan, phase_acc):
        y = acc * scale + shift
        if relu:
            y = jnp.maximum(y, 0.0)
        start = row0 * qw
        o_ref[0, start:start + q * qw, :] = y.astype(o_ref.dtype)


def _run_fused_block(x4, w_taps, bias2d, plan, relu):
    n, r, wc, cin = x4.shape
    kk, _, cout = w_taps.shape
    total_px = sum(q * qw for (_, q, qw, _) in plan)
    kernel = functools.partial(_fused_block_kernel, plan=plan,
                               total_px=total_px, eps=_EPS, relu=relu)
    return pl.pallas_call(
        kernel,
        out_shape=jax.ShapeDtypeStruct((n, total_px, cout), jnp.float32),
        grid_spec=pltpu.PrefetchScalarGridSpec(
            num_scalar_prefetch=0,
            grid=(n,),
            in_specs=[
                pl.BlockSpec((1, r, wc, cin), lambda i: (i, 0, 0, 0)),
                pl.BlockSpec((kk, cin, cout), lambda i: (0, 0, 0)),
                pl.BlockSpec((1, cout), lambda i: (0, 0)),
            ],
            out_specs=pl.BlockSpec((1, total_px, cout), lambda i: (i, 0, 0))),
        compiler_params=pltpu.CompilerParams(
            dimension_semantics=("parallel",)),
    )(x4, w_taps, bias2d)


# ---------------------------------------------------------------------------
# Downsampling branch: Conv2d(reflect pad) + InstanceNorm + optional ReLU
# ---------------------------------------------------------------------------
def conv_block_down(x_nchw, weight, bias, *, stride=1, padding=0,
                    add_activation=True):
    n, cin, h, w = x_nchw.shape
    cout, cin_w, kh, kw = weight.shape
    assert cin_w == cin and kh == kw, "square kernels, matching channels"
    k, s, p = kh, stride, padding

    x = jnp.transpose(x_nchw, (0, 2, 3, 1))                        # NHWC
    if p:
        x = jnp.pad(x, ((0, 0), (p, p), (p, p), (0, 0)), mode="reflect")
    hp, wp = h + 2 * p, w + 2 * p
    oh, ow = (hp - k) // s + 1, (wp - k) // s + 1

    # Phase-decompose the padded input by the stride so every conv tap becomes
    # a unit-stride static window inside the kernel (no im2col in HBM).
    phr, phc = _cdiv(hp, s), _cdiv(wp, s)
    x = jnp.pad(x, ((0, 0), (0, s * phr - hp), (0, s * phc - wp), (0, 0)))
    x = x.reshape(n, phr, s, phc, s, cin).transpose(0, 2, 4, 1, 3, 5)
    x = x.reshape(n, s * s * phr, phc, cin).astype(jnp.bfloat16)

    taps = tuple((((i % s) * s + (j % s)) * phr + i // s,  # phase row offset
                  j // s,                                  # phase col offset
                  i * k + j)                               # weight tap index
                 for i in range(k) for j in range(k))
    plan = ((0, oh, ow, taps),)

    w_taps = weight.transpose(2, 3, 1, 0).reshape(k * k, cin, cout)
    y = _run_fused_block(x, w_taps.astype(jnp.bfloat16),
                         bias.reshape(1, cout).astype(jnp.float32),
                         plan, add_activation)
    y = y.reshape(n, oh, ow, cout)
    return jnp.transpose(y, (0, 3, 1, 2))                          # NCHW


# ---------------------------------------------------------------------------
# Upsampling branch: ConvTranspose2d + InstanceNorm + optional ReLU
# (sub-pixel decomposition - no multiplies against dilation zeros)
# ---------------------------------------------------------------------------
def conv_block_up(x_nchw, weight, bias, *, stride=1, padding=0,
                  output_padding=0, add_activation=True):
    n, cin, h, w = x_nchw.shape
    cin_w, cout, kh, kw = weight.shape
    assert cin_w == cin and kh == kw
    k, s, p, op = kh, stride, padding, output_padding
    oh = (h - 1) * s - 2 * p + k + op
    ow = (w - 1) * s - 2 * p + k + op
    assert oh % s == 0 and ow % s == 0, "phase decomposition needs s | OH, OW"
    qh, qw = oh // s, ow // s

    def axis_plan(r):
        a0 = (r + p) % s                 # smallest contributing tap index
        d = (r + p) // s                 # input offset for that tap
        m = max(0, _cdiv(k - a0, s))     # number of contributing taps
        return a0, d, m

    plans = [axis_plan(r) for r in range(s)]
    pad_lo = max([0] + [(m - 1) - d for (_, d, m) in plans if m > 0])
    pad_hi_h = max([0] + [(qh - 1) + d - (h - 1) for (_, d, m) in plans if m > 0])
    pad_hi_w = max([0] + [(qw - 1) + d - (w - 1) for (_, d, m) in plans if m > 0])

    x = jnp.transpose(x_nchw, (0, 2, 3, 1))                        # NHWC
    x = jnp.pad(x, ((0, 0), (pad_lo, pad_hi_h), (pad_lo, pad_hi_w), (0, 0)))
    x = x.astype(jnp.bfloat16)

    plan = []
    for rh in range(s):
        a0h, dh, mh = plans[rh]
        for rw in range(s):
            a0w, dw, mw = plans[rw]
            taps = tuple((dh - mi + pad_lo,
                          dw - li + pad_lo,
                          (a0h + s * mi) * k + (a0w + s * li))
                         for mi in range(mh) for li in range(mw))
            plan.append(((rh * s + rw) * qh, qh, qw, taps))
    plan = tuple(plan)

    w_taps = weight.transpose(2, 3, 0, 1).reshape(k * k, cin, cout)
    y_flat = _run_fused_block(x, w_taps.astype(jnp.bfloat16),
                              bias.reshape(1, cout).astype(jnp.float32),
                              plan, add_activation)

    # pixel-shuffle the phase-stacked flat pixels back to the full-res image
    y = y_flat.reshape(n, s, s, qh, qw, cout).transpose(0, 3, 1, 4, 2, 5)
    y = y.reshape(n, oh, ow, cout)
    return jnp.transpose(y, (0, 3, 1, 2))                          # NCHW


def convolutional_block_forward(x, weight, bias, *, is_downsampling=True,
                                add_activation=True, stride=1, padding=0,
                                output_padding=0):
    """Forward pass of the PyTorch `ConvolutionalBlock` (NCHW in / NCHW out)."""
    if is_downsampling:
        return conv_block_down(x, weight, bias, stride=stride, padding=padding,
                               add_activation=add_activation)
    return conv_block_up(x, weight, bias, stride=stride, padding=padding,
                         output_padding=output_padding,
                         add_activation=add_activation)


# ---------------------------------------------------------------------------
# Pure-JAX references (for an in-script correctness check)
# ---------------------------------------------------------------------------
def _instance_norm_act(y, relu):
    mean = jnp.mean(y, axis=(1, 2), keepdims=True)
    var = jnp.mean((y - mean) ** 2, axis=(1, 2), keepdims=True)
    y = (y - mean) * jax.lax.rsqrt(var + _EPS)
    return jnp.maximum(y, 0.0) if relu else y


def _ref_down(x_nchw, weight, bias, *, stride, padding, add_activation):
    x = jnp.transpose(x_nchw, (0, 2, 3, 1))
    if padding:
        x = jnp.pad(x, ((0, 0), (padding,) * 2, (padding,) * 2, (0, 0)),
                    mode="reflect")
    x = x.astype(jnp.bfloat16).astype(jnp.float32)
    wf = weight.astype(jnp.bfloat16).astype(jnp.float32).transpose(2, 3, 1, 0)
    y = jax.lax.conv_general_dilated(
        x, wf, (stride, stride), "VALID",
        dimension_numbers=("NHWC", "HWIO", "NHWC"),
        precision=jax.lax.Precision.HIGHEST)
    y = _instance_norm_act(y + bias.reshape(1, 1, 1, -1), add_activation)
    return jnp.transpose(y, (0, 3, 1, 2))


def _ref_up(x_nchw, weight, bias, *, stride, padding, output_padding,
            add_activation):
    k, s, p, op = weight.shape[-1], stride, padding, output_padding
    x = jnp.transpose(x_nchw, (0, 2, 3, 1)).astype(jnp.bfloat16).astype(jnp.float32)
    wf = jnp.flip(weight, (2, 3)).transpose(2, 3, 0, 1)
    wf = wf.astype(jnp.bfloat16).astype(jnp.float32)
    y = jax.lax.conv_general_dilated(
        x, wf, (1, 1),
        padding=((k - 1 - p, k - 1 - p + op), (k - 1 - p, k - 1 - p + op)),
        lhs_dilation=(s, s),
        dimension_numbers=("NHWC", "HWIO", "NHWC"),
        precision=jax.lax.Precision.HIGHEST)
    y = _instance_norm_act(y + bias.reshape(1, 1, 1, -1), add_activation)
    return jnp.transpose(y, (0, 3, 1, 2))


# ---------------------------------------------------------------------------
if __name__ == "__main__":
    key = jax.random.PRNGKey(0)
    k1, k2, k3, k4, k5, k6 = jax.random.split(key, 6)

    # Downsampling block: Conv2d(4->8, k=3, s=2, p=1, reflect) + IN + ReLU
    x_dn = jax.random.normal(k1, (2, 4, 16, 16), jnp.float32)
    w_dn = 0.1 * jax.random.normal(k2, (8, 4, 3, 3), jnp.float32)
    b_dn = 0.1 * jax.random.normal(k3, (8,), jnp.float32)
    y_dn = convolutional_block_forward(x_dn, w_dn, b_dn, is_downsampling=True,
                                       add_activation=True, stride=2, padding=1)
    y_dn_ref = _ref_down(x_dn, w_dn, b_dn, stride=2, padding=1,
                         add_activation=True)

    # Upsampling block: ConvTranspose2d(4->8, k=3, s=2, p=1, op=1) + IN + ReLU
    x_up = jax.random.normal(k4, (2, 4, 8, 8), jnp.float32)
    w_up = 0.1 * jax.random.normal(k5, (4, 8, 3, 3), jnp.float32)
    b_up = 0.1 * jax.random.normal(k6, (8,), jnp.float32)
    y_up = convolutional_block_forward(x_up, w_up, b_up, is_downsampling=False,
                                       add_activation=True, stride=2, padding=1,
                                       output_padding=1)
    y_up_ref = _ref_up(x_up, w_up, b_up, stride=2, padding=1, output_padding=1,
                       add_activation=True)

    # add_activation=False branch (Identity epilogue)
    y_id = convolutional_block_forward(x_dn, w_dn, b_dn, is_downsampling=True,
                                       add_activation=False, stride=2, padding=1)
    y_id_ref = _ref_down(x_dn, w_dn, b_dn, stride=2, padding=1,
                         add_activation=False)

    for got, ref in ((y_dn, y_dn_ref), (y_up, y_up_ref), (y_id, y_id_ref)):
        got = jax.block_until_ready(got)
        assert got.shape == ref.shape, (got.shape, ref.shape)
        assert bool(jnp.all(jnp.isfinite(got)))
        err = float(jnp.max(jnp.abs(got - jnp.asarray(ref))))
        assert err < 5e-3, f"max abs err {err}"

    assert y_dn.shape == (2, 8, 8, 8)
    assert y_up.shape == (2, 8, 16, 16)
    print("KERNEL_OK")
</pallas_src>

<mosaic_0001>
module attributes {stable_mosaic.version = 11 : i64} {
  func.func @_fused_block_kernel(%arg0: i32, %arg1: memref<1x36x9x4xbf16, #tpu.memory_space<vmem>>, %arg2: memref<9x4x8xbf16, #tpu.memory_space<vmem>>, %arg3: memref<1x8xf32, #tpu.memory_space<vmem>>, %arg4: memref<1x64x8xf32, #tpu.memory_space<vmem>>) attributes {dimension_semantics = [#tpu.dimension_semantics<parallel>], iteration_bounds = array<i64: 2>, scalar_prefetch = 0 : i64, scratch_operands = 0 : i64, tpu.core_type = #tpu.core_type<tc>, window_params = [{transform_indices = @transform_0, window_bounds = array<i64: 1, 36, 9, 4>}, {pipeline_mode = #tpu.pipeline_mode<synchronous>, transform_indices = @transform_1, window_bounds = array<i64: 9, 4, 8>}, {pipeline_mode = #tpu.pipeline_mode<synchronous>, transform_indices = @transform_2, window_bounds = array<i64: 1, 8>}, {transform_indices = @transform_3, window_bounds = array<i64: 1, 64, 8>}]} {
    %c0 = arith.constant 0 : index
    %c0_0 = arith.constant 0 : index
    %0 = vector.load %arg3[%c0, %c0_0] : memref<1x8xf32, #tpu.memory_space<vmem>>, vector<1x8xf32>
    %cst = arith.constant 0.000000e+00 : f32
    %1 = vector.broadcast %cst : f32 to vector<1x8xf32>
    %cst_1 = arith.constant 0.000000e+00 : f32
    %2 = vector.broadcast %cst_1 : f32 to vector<64x8xf32>
    %c0_2 = arith.constant 0 : index
    %c0_3 = arith.constant 0 : index
    %c0_4 = arith.constant 0 : index
    %c0_5 = arith.constant 0 : index
    %3 = vector.load %arg1[%c0_2, %c0_3, %c0_4, %c0_5] : memref<1x36x9x4xbf16, #tpu.memory_space<vmem>>, vector<1x8x8x4xbf16>
    %4 = vector.shape_cast %3 : vector<1x8x8x4xbf16> to vector<8x8x4xbf16>
    %5 = vector.shape_cast %4 : vector<8x8x4xbf16> to vector<64x4xbf16>
    %c0_6 = arith.constant 0 : index
    %c0_7 = arith.constant 0 : index
    %c0_8 = arith.constant 0 : index
    %6 = vector.load %arg2[%c0_6, %c0_7, %c0_8] : memref<9x4x8xbf16, #tpu.memory_space<vmem>>, vector<1x4x8xbf16>
    %7 = vector.shape_cast %6 : vector<1x4x8xbf16> to vector<4x8xbf16>
    %cst_9 = arith.constant dense<0.000000e+00> : vector<64x8xf32>
    %8 = tpu.matmul %5, %7, %cst_9 {dimension_numbers = #tpu.dot_dimension_numbers<[1], [0], [0], [1], [0, 0, 1, 1], [], []>} : vector<64x4xbf16>, vector<4x8xbf16>, vector<64x8xf32> -> vector<64x8xf32>
    %9 = arith.addf %2, %8 : vector<64x8xf32>
    %c0_10 = arith.constant 0 : index
    %c9 = arith.constant 9 : index
    %c0_11 = arith.constant 0 : index
    %c0_12 = arith.constant 0 : index
    %10 = vector.load %arg1[%c0_10, %c9, %c0_11, %c0_12] : memref<1x36x9x4xbf16, #tpu.memory_space<vmem>>, vector<1x8x8x4xbf16>
    %11 = vector.shape_cast %10 : vector<1x8x8x4xbf16> to vector<8x8x4xbf16>
    %12 = vector.shape_cast %11 : vector<8x8x4xbf16> to vector<64x4xbf16>
    %c1 = arith.constant 1 : index
    %c0_13 = arith.constant 0 : index
    %c0_14 = arith.constant 0 : index
    %13 = vector.load %arg2[%c1, %c0_13, %c0_14] : memref<9x4x8xbf16, #tpu.memory_space<vmem>>, vector<1x4x8xbf16>
    %14 = vector.shape_cast %13 : vector<1x4x8xbf16> to vector<4x8xbf16>
    %cst_15 = arith.constant dense<0.000000e+00> : vector<64x8xf32>
    %15 = tpu.matmul %12, %14, %cst_15 {dimension_numbers = #tpu.dot_dimension_numbers<[1], [0], [0], [1], [0, 0, 1, 1], [], []>} : vector<64x4xbf16>, vector<4x8xbf16>, vector<64x8xf32> -> vector<64x8xf32>
    %16 = arith.addf %9, %15 : vector<64x8xf32>
    %c0_16 = arith.constant 0 : index
    %c0_17 = arith.constant 0 : index
    %c1_18 = arith.constant 1 : index
    %c0_19 = arith.constant 0 : index
    %17 = vector.load %arg1[%c0_16, %c0_17, %c1_18, %c0_19] : memref<1x36x9x4xbf16, #tpu.memory_space<vmem>>, vector<1x8x8x4xbf16>
    %18 = vector.shape_cast %17 : vector<1x8x8x4xbf16> to vector<8x8x4xbf16>
    %19 = vector.shape_cast %18 : vector<8x8x4xbf16> to vector<64x4xbf16>
    %c2 = arith.constant 2 : index
    %c0_20 = arith.constant 0 : index
    %c0_21 = arith.constant 0 : index
    %20 = vector.load %arg2[%c2, %c0_20, %c0_21] : memref<9x4x8xbf16, #tpu.memory_space<vmem>>, vector<1x4x8xbf16>
    %21 = vector.shape_cast %20 : vector<1x4x8xbf16> to vector<4x8xbf16>
    %cst_22 = arith.constant dense<0.000000e+00> : vector<64x8xf32>
    %22 = tpu.matmul %19, %21, %cst_22 {dimension_numbers = #tpu.dot_dimension_numbers<[1], [0], [0], [1], [0, 0, 1, 1], [], []>} : vector<64x4xbf16>, vector<4x8xbf16>, vector<64x8xf32> -> vector<64x8xf32>
    %23 = arith.addf %16, %22 : vector<64x8xf32>
    %c0_23 = arith.constant 0 : index
    %c18 = arith.constant 18 : index
    %c0_24 = arith.constant 0 : index
    %c0_25 = arith.constant 0 : index
    %24 = vector.load %arg1[%c0_23, %c18, %c0_24, %c0_25] : memref<1x36x9x4xbf16, #tpu.memory_space<vmem>>, vector<1x8x8x4xbf16>
    %25 = vector.shape_cast %24 : vector<1x8x8x4xbf16> to vector<8x8x4xbf16>
    %26 = vector.shape_cast %25 : vector<8x8x4xbf16> to vector<64x4xbf16>
    %c3 = arith.constant 3 : index
    %c0_26 = arith.constant 0 : index
    %c0_27 = arith.constant 0 : index
    %27 = vector.load %arg2[%c3, %c0_26, %c0_27] : memref<9x4x8xbf16, #tpu.memory_space<vmem>>, vector<1x4x8xbf16>
    %28 = vector.shape_cast %27 : vector<1x4x8xbf16> to vector<4x8xbf16>
    %cst_28 = arith.constant dense<0.000000e+00> : vector<64x8xf32>
    %29 = tpu.matmul %26, %28, %cst_28 {dimension_numbers = #tpu.dot_dimension_numbers<[1], [0], [0], [1], [0, 0, 1, 1], [], []>} : vector<64x4xbf16>, vector<4x8xbf16>, vector<64x8xf32> -> vector<64x8xf32>
    %30 = arith.addf %23, %29 : vector<64x8xf32>
    %c0_29 = arith.constant 0 : index
    %c27 = arith.constant 27 : index
    %c0_30 = arith.constant 0 : index
    %c0_31 = arith.constant 0 : index
    %31 = vector.load %arg1[%c0_29, %c27, %c0_30, %c0_31] : memref<1x36x9x4xbf16, #tpu.memory_space<vmem>>, vector<1x8x8x4xbf16>
    %32 = vector.shape_cast %31 : vector<1x8x8x4xbf16> to vector<8x8x4xbf16>
    %33 = vector.shape_cast %32 : vector<8x8x4xbf16> to vector<64x4xbf16>
    %c4 = arith.constant 4 : index
    %c0_32 = arith.constant 0 : index
    %c0_33 = arith.constant 0 : index
    %34 = vector.load %arg2[%c4, %c0_32, %c0_33] : memref<9x4x8xbf16, #tpu.memory_space<vmem>>, vector<1x4x8xbf16>
    %35 = vector.shape_cast %34 : vector<1x4x8xbf16> to vector<4x8xbf16>
    %cst_34 = arith.constant dense<0.000000e+00> : vector<64x8xf32>
    %36 = tpu.matmul %33, %35, %cst_34 {dimension_numbers = #tpu.dot_dimension_numbers<[1], [0], [0], [1], [0, 0, 1, 1], [], []>} : vector<64x4xbf16>, vector<4x8xbf16>, vector<64x8xf32> -> vector<64x8xf32>
    %37 = arith.addf %30, %36 : vector<64x8xf32>
    %c0_35 = arith.constant 0 : index
    %c18_36 = arith.constant 18 : index
    %c1_37 = arith.constant 1 : index
    %c0_38 = arith.constant 0 : index
    %38 = vector.load %arg1[%c0_35, %c18_36, %c1_37, %c0_38] : memref<1x36x9x4xbf16, #tpu.memory_space<vmem>>, vector<1x8x8x4xbf16>
    %39 = vector.shape_cast %38 : vector<1x8x8x4xbf16> to vector<8x8x4xbf16>
    %40 = vector.shape_cast %39 : vector<8x8x4xbf16> to vector<64x4xbf16>
    %c5 = arith.constant 5 : index
    %c0_39 = arith.constant 0 : index
    %c0_40 = arith.constant 0 : index
    %41 = vector.load %arg2[%c5, %c0_39, %c0_40] : memref<9x4x8xbf16, #tpu.memory_space<vmem>>, vector<1x4x8xbf16>
    %42 = vector.shape_cast %41 : vector<1x4x8xbf16> to vector<4x8xbf16>
    %cst_41 = arith.constant dense<0.000000e+00> : vector<64x8xf32>
    %43 = tpu.matmul %40, %42, %cst_41 {dimension_numbers = #tpu.dot_dimension_numbers<[1], [0], [0], [1], [0, 0, 1, 1], [], []>} : vector<64x4xbf16>, vector<4x8xbf16>, vector<64x8xf32> -> vector<64x8xf32>
    %44 = arith.addf %37, %43 : vector<64x8xf32>
    %c0_42 = arith.constant 0 : index
    %c1_43 = arith.constant 1 : index
    %c0_44 = arith.constant 0 : index
    %c0_45 = arith.constant 0 : index
    %45 = vector.load %arg1[%c0_42, %c1_43, %c0_44, %c0_45] : memref<1x36x9x4xbf16, #tpu.memory_space<vmem>>, vector<1x8x8x4xbf16>
    %46 = vector.shape_cast %45 : vector<1x8x8x4xbf16> to vector<8x8x4xbf16>
    %47 = vector.shape_cast %46 : vector<8x8x4xbf16> to vector<64x4xbf16>
    %c6 = arith.constant 6 : index
    %c0_46 = arith.constant 0 : index
    %c0_47 = arith.constant 0 : index
    %48 = vector.load %arg2[%c6, %c0_46, %c0_47] : memref<9x4x8xbf16, #tpu.memory_space<vmem>>, vector<1x4x8xbf16>
    %49 = vector.shape_cast %48 : vector<1x4x8xbf16> to vector<4x8xbf16>
    %cst_48 = arith.constant dense<0.000000e+00> : vector<64x8xf32>
    %50 = tpu.matmul %47, %49, %cst_48 {dimension_numbers = #tpu.dot_dimension_numbers<[1], [0], [0], [1], [0, 0, 1, 1], [], []>} : vector<64x4xbf16>, vector<4x8xbf16>, vector<64x8xf32> -> vector<64x8xf32>
    %51 = arith.addf %44, %50 : vector<64x8xf32>
    %c0_49 = arith.constant 0 : index
    %c10 = arith.constant 10 : index
    %c0_50 = arith.constant 0 : index
    %c0_51 = arith.constant 0 : index
    %52 = vector.load %arg1[%c0_49, %c10, %c0_50, %c0_51] : memref<1x36x9x4xbf16, #tpu.memory_space<vmem>>, vector<1x8x8x4xbf16>
    %53 = vector.shape_cast %52 : vector<1x8x8x4xbf16> to vector<8x8x4xbf16>
    %54 = vector.shape_cast %53 : vector<8x8x4xbf16> to vector<64x4xbf16>
    %c7 = arith.constant 7 : index
    %c0_52 = arith.constant 0 : index
    %c0_53 = arith.constant 0 : index
    %55 = vector.load %arg2[%c7, %c0_52, %c0_53] : memref<9x4x8xbf16, #tpu.memory_space<vmem>>, vector<1x4x8xbf16>
    %56 = vector.shape_cast %55 : vector<1x4x8xbf16> to vector<4x8xbf16>
    %cst_54 = arith.constant dense<0.000000e+00> : vector<64x8xf32>
    %57 = tpu.matmul %54, %56, %cst_54 {dimension_numbers = #tpu.dot_dimension_numbers<[1], [0], [0], [1], [0, 0, 1, 1], [], []>} : vector<64x4xbf16>, vector<4x8xbf16>, vector<64x8xf32> -> vector<64x8xf32>
    %58 = arith.addf %51, %57 : vector<64x8xf32>
    %c0_55 = arith.constant 0 : index
    %c1_56 = arith.constant 1 : index
    %c1_57 = arith.constant 1 : index
    %c0_58 = arith.constant 0 : index
    %59 = vector.load %arg1[%c0_55, %c1_56, %c1_57, %c0_58] : memref<1x36x9x4xbf16, #tpu.memory_space<vmem>>, vector<1x8x8x4xbf16>
    %60 = vector.shape_cast %59 : vector<1x8x8x4xbf16> to vector<8x8x4xbf16>
    %61 = vector.shape_cast %60 : vector<8x8x4xbf16> to vector<64x4xbf16>
    %c8 = arith.constant 8 : index
    %c0_59 = arith.constant 0 : index
    %c0_60 = arith.constant 0 : index
    %62 = vector.load %arg2[%c8, %c0_59, %c0_60] : memref<9x4x8xbf16, #tpu.memory_space<vmem>>, vector<1x4x8xbf16>
    %63 = vector.shape_cast %62 : vector<1x4x8xbf16> to vector<4x8xbf16>
    %cst_61 = arith.constant dense<0.000000e+00> : vector<64x8xf32>
    %64 = tpu.matmul %61, %63, %cst_61 {dimension_numbers = #tpu.dot_dimension_numbers<[1], [0], [0], [1], [0, 0, 1, 1], [], []>} : vector<64x4xbf16>, vector<4x8xbf16>, vector<64x8xf32> -> vector<64x8xf32>
    %65 = arith.addf %58, %64 : vector<64x8xf32>
    %66 = vector.broadcast %0 : vector<1x8xf32> to vector<64x8xf32>
    %67 = arith.addf %65, %66 : vector<64x8xf32>
    %cst_62 = arith.constant dense<0.000000e+00> : vector<8xf32>
    %68 = vector.multi_reduction <add>, %67, %cst_62 [0] : vector<64x8xf32> to vector<8xf32>
    %69 = vector.shape_cast %68 : vector<8xf32> to vector<1x8xf32>
    %70 = arith.addf %1, %69 : vector<1x8xf32>
    %cst_63 = arith.constant 1.562500e-02 : f32
    %71 = vector.broadcast %cst_63 : f32 to vector<1x8xf32>
    %72 = arith.mulf %70, %71 : vector<1x8xf32>
    %cst_64 = arith.constant 0.000000e+00 : f32
    %73 = vector.broadcast %cst_64 : f32 to vector<1x8xf32>
    %74 = vector.broadcast %72 : vector<1x8xf32> to vector<64x8xf32>
    %75 = arith.subf %67, %74 : vector<64x8xf32>
    %76 = arith.mulf %75, %75 : vector<64x8xf32>
    %cst_65 = arith.constant dense<0.000000e+00> : vector<8xf32>
    %77 = vector.multi_reduction <add>, %76, %cst_65 [0] : vector<64x8xf32> to vector<8xf32>
    %78 = vector.shape_cast %77 : vector<8xf32> to vector<1x8xf32>
    %79 = arith.addf %73, %78 : vector<1x8xf32>
    %cst_66 = arith.constant 1.562500e-02 : f32
    %80 = vector.broadcast %cst_66 : f32 to vector<1x8xf32>
    %81 = arith.mulf %79, %80 : vector<1x8xf32>
    %cst_67 = arith.constant 9.99999974E-6 : f32
    %82 = vector.broadcast %cst_67 : f32 to vector<1x8xf32>
    %83 = arith.addf %81, %82 : vector<1x8xf32>
    %84 = math.rsqrt %83 : vector<1x8xf32>
    %cst_68 = arith.constant 0.000000e+00 : f32
    %85 = vector.broadcast %cst_68 : f32 to vector<1x8xf32>
    %86 = arith.subf %85, %72 : vector<1x8xf32>
    %87 = arith.mulf %86, %84 : vector<1x8xf32>
    %88 = vector.broadcast %84 : vector<1x8xf32> to vector<64x8xf32>
    %89 = arith.mulf %67, %88 : vector<64x8xf32>
    %90 = vector.broadcast %87 : vector<1x8xf32> to vector<64x8xf32>
    %91 = arith.addf %89, %90 : vector<64x8xf32>
    %cst_69 = arith.constant 0.000000e+00 : f32
    %92 = vector.broadcast %cst_69 : f32 to vector<64x8xf32>
    %93 = arith.maximumf %91, %92 : vector<64x8xf32>
    %c0_70 = arith.constant 0 : index
    %c0_71 = arith.constant 0 : index
    %c0_72 = arith.constant 0 : index
    %94 = vector.load %arg4[%c0_70, %c0_71, %c0_72] : memref<1x64x8xf32, #tpu.memory_space<vmem>>, vector<1x64x8xf32>
    %95 = vector.shape_cast %94 : vector<1x64x8xf32> to vector<64x8xf32>
    %96 = vector.shape_cast %93 : vector<64x8xf32> to vector<1x64x8xf32>
    tpu.vector_store %arg4[%c0_70, %c0_71, %c0_72], %96 {strides = array<i32>} : memref<1x64x8xf32, #tpu.memory_space<vmem>>, vector<1x64x8xf32>,
    return
  }
  func.func @transform_0(%arg0: i32) -> (i32, i32, i32, i32) {
    %c0_i32 = arith.constant 0 : i32
    %c0_i32_0 = arith.constant 0 : i32
    %c0_i32_1 = arith.constant 0 : i32
    %c0_i32_2 = arith.constant 0 : i32
    return %arg0, %c0_i32, %c0_i32_0, %c0_i32_1 : i32, i32, i32, i32
  }
  func.func @transform_1(%arg0: i32) -> (i32, i32, i32) {
    %c0_i32 = arith.constant 0 : i32
    %c0_i32_0 = arith.constant 0 : i32
    %c0_i32_1 = arith.constant 0 : i32
    %c0_i32_2 = arith.constant 0 : i32
    return %c0_i32, %c0_i32_0, %c0_i32_1 : i32, i32, i32
  }
  func.func @transform_2(%arg0: i32) -> (i32, i32) {
    %c0_i32 = arith.constant 0 : i32
    %c0_i32_0 = arith.constant 0 : i32
    %c0_i32_1 = arith.constant 0 : i32
    return %c0_i32, %c0_i32_0 : i32, i32
  }
  func.func @transform_3(%arg0: i32) -> (i32, i32, i32) {
    %c0_i32 = arith.constant 0 : i32
    %c0_i32_0 = arith.constant 0 : i32
    %c0_i32_1 = arith.constant 0 : i32
    return %arg0, %c0_i32, %c0_i32_0 : i32, i32, i32
  }
}

</mosaic_0001>

<bundles_post_ra>
// kernel: tpu_custom_call.1
= control target key start
LH: loop header
LB: loop body
LE: loop exit
PB: predicated region body
PF: predicated region fallthrough
CT: control target
= control target key end

     0   :  { %s1704_s12 = smov 0   ;;  %s2026_s0 = inlined_call_operand.vmem [shape: bf16[2,36,9,4], index: 0, kind: input, shape index: {}]   ;;  %s2027_s1 = inlined_call_operand.vmem [shape: bf16[9,4,8], index: 1, kind: input, shape index: {}]   ;;  %s2028_s2 = inlined_call_operand.vmem [shape: f32[1,8], index: 2, kind: input, shape index: {}]   ;;  %s2029_s3 = inlined_call_operand.vmem [shape: f32[2,64,8], index: 3, kind: output, shape index: {}]  }
   0x1 LB: > { %s1414_s13 = sadd.s32 4294967295, %s1682_s12   ;;  %p1418_p0 = scmp.ge.s32.totalorder %s1682_s12, 1  ;;  %s1682_s12 = sphi %s1704_s12, %s13_s12  }
   0x2   : > { %p137_p1 = scmp.lt.s32.totalorder %s1682_s12, 3 }
   0x4   : > { %p138_p2 = pnand %p1418_p0, %p137_p1 }
   0x5   : > { %p161_p3 = scmp.lt.s32.totalorder (!%p138_p2), %s1414_s13, 1 }
   0x6   : > { %141 = sbr.rel (%p138_p2) target bundleno = 380 (0x17c), region = 32 }
   0xb   : > { %v1430_v0 = vld [vmem:[%s2027_s1 + $0x2] sm:$0x3]  ;;  %vm226_vm0 = vcmask 1041408   ;;  %v1471_v2 = vld [vmem:[%s2027_s1 + $0x4] sm:$0x3]  ;;  %s2033_s13 = smov (!%p161_p3, %s1414_s13), 1 }
   0xc   : > { %v228_v1 = vsel %vm226_vm0, %v1430_v0, 0  ;;  %v1484_v3 = vld [vmem:[%s2027_s1 + $0x6] sm:$0x3]  ;;  %v481_v4 = vsel %vm226_vm0, %v1471_v2, 0  ;;  %v181_v6 = vld [vmem:[%s2027_s1] sm:$0x3] }
   0xd   : > { %1661 = vmatpush.bf16.msra.mxu1 %v228_v1  ;;  %1662 = vmatpush.bf16.msra.mxu2 %v228_v1  ;;  %v564_v5 = vsel %vm226_vm0, %v1484_v3, 0  ;;  %v292_v7 = vsel %vm226_vm0, %v181_v6, 0  ;;  %v1513_v8 = vld [vmem:[%s2027_s1 + $0x8] sm:$0x3]  ;;  %s1664_s24 = smul.u32 288, %s2033_s13  ;;  %vm213_vm1 = vcmask 31744  }
   0xe   : > { %1663 = vmatpush.bf16.msra.mxu3 %v228_v1  ;;  %237 = vmatpush.bf16.msra.mxu0 %v228_v1  ;;  %v647_v9 = vsel %vm226_vm0, %v1513_v8, 0  ;;  %v1563_v10 = vld [vmem:[%s2027_s1 + $0xc] sm:$0x3]  ;;  %v1592_v11 = vld [vmem:[%s2027_s1 + $0xe] sm:$0x3]  ;;  %vm1251_vm5 = vcmask 64512  }
   0xf   : > { %s1741_s29 = scalar_lea.vmem %s2026_s0, %s1664_s24  ;;  %v1550_v12 = vld [vmem:[%s2027_s1 + $0xa] sm:$0x3]  ;;  %v924_v24 = vsel %vm226_vm0, %v1563_v10, 0  ;;  %v1007_v28 = vsel %vm226_vm0, %v1592_v11, 0  ;;  %v1629_v38 = vld [vmem:[%s2027_s1 + $0x10] sm:$0x3] }
  0x10   : > { %v1437_v13 = vld [vmem:[%s1741_s29 + $0x58] sm:$0xf]  ;;  %v1642_v14 = vld [vmem:[%s1741_s29 + $0x5c] sm:$0xf0]  ;;  %v1441_v15 = vld [vmem:[%s1741_s29 + $0x68] sm:$0xf] }
  0x11   : > { %490 = vmatpush.bf16.msrb.mxu2 %v481_v4  ;;  %301 = vmatpush.bf16.msrb.mxu1 %v292_v7  ;;  %v1438_v16 = vor.u32 %v1642_v14, %v1437_v13  ;;  %v1643_v17 = vld [vmem:[%s1741_s29 + $0x6c] sm:$0xf0]  ;;  %v1445_v18 = vld [vmem:[%s1741_s29 + $0x78] sm:$0xf]  ;;  %v1644_v19 = vld [vmem:[%s1741_s29 + $0x7c] sm:$0xf0] }
  0x12   : > { %573 = vmatpush.bf16.msrb.mxu3 %v564_v5  ;;  %656 = vmatpush.bf16.msrb.mxu0 %v647_v9  ;;  %v1442_v20 = vor.u32 %v1643_v17, %v1441_v15  ;;  %v1446_v21 = vor.u32 %v1644_v19, %v1445_v18  ;;  %v1433_v22 = vld [vmem:[%s1741_s29 + $0x48] sm:$0xf]  ;;  %v1641_v23 = vld [vmem:[%s1741_s29 + $0x4c] sm:$0xf0]  ;;  %v323_v26 = vld [vmem:[%s1741_s29] sm:$0xf] }
  0x13   : > { %1448 = vmatmul.msk.bf16.vlgmr.msra.gmra.mxu1 %vm213_vm1, %v1438_v16  ;;  %v1434_v25 = vor.u32 %v1641_v23, %v1433_v22  ;;  %v324_v27 = vld [vmem:[%s1741_s29 + $0x4] sm:$0x1]  ;;  %v841_v29 = vsel %vm226_vm0, %v1550_v12, 0  ;;  %v325_v30 = vld [vmem:[%s1741_s29 + $0x8] sm:$0xf]  ;;  %v343_v32 = vshrl.u32 %v323_v26, 16 }
  0x14   : > { %1449 = vmatmul.msk.bf16.vlgmr.msra.gmra.mxu2 %vm213_vm1, %v1442_v20  ;;  %1450 = vmatmul.msk.bf16.vlgmr.msra.gmra.mxu3 %vm213_vm1, %v1446_v21  ;;  %v326_v31 = vld [vmem:[%s1741_s29 + $0xc] sm:$0x1]  ;;  %v346_v33 = vshll.u32 %v323_v26, 16  ;;  %v352_v34 = vshll.u32 %v324_v27, 16  ;;  %v357_v35 = vshrl.u32 %v325_v30, 16  ;;  %v360_v36 = vshll.u32 %v325_v30, 16 }
  0x15   : > { %1447 = vmatmul.msk.bf16.vlgmr.msra.gmra.mxu0 %vm213_vm1, %v1434_v25  ;;  %v366_v37 = vshll.u32 %v326_v31, 16  ;;  %933 = vmatpush.bf16.msra.mxu2 %v924_v24  ;;  %vm339_vm2 = vsmask.f32 3328  ;;  %vm340_vm3 = vsmask.f32 7440  ;;  %v345_v39 = vrot.slane %v343_v32, 4 }
  0x16   : > { %v348_v40 = vrot.slane %v346_v33, 5  ;;  %1016 = vmatpush.bf16.msra.mxu3 %v1007_v28  ;;  %850 = vmatpush.bf16.msra.mxu1 %v841_v29  ;;  %v359_v41 = vrot.slane %v357_v35, 4  ;;  %v362_v42 = vrot.slane %v360_v36, 5  ;;  %v354_v44 = vrot.slane %v352_v34, 5  ;;  %vm1772_vm4 = vmor %vm339_vm2, %vm340_vm3  ;;  %v327_v49 = vld [vmem:[%s1741_s29 + $0x10] sm:$0xf] }
  0x17   : > { %v1201_v45 = vsel %vm226_vm0, %v1629_v38, 0  ;;  %v368_v48 = vrot.slane %v366_v37, 5  ;;  %v329_v50 = vld [vmem:[%s1741_s29 + $0x18] sm:$0xf]  ;;  %v1453_v51 = vld [vmem:[%s1741_s29] sm:$0xf] }
  0x18   : > { %v349_v43 = vor.u32 %v348_v40, %v345_v39  ;;  %v363_v47 = vor.u32 %v362_v42, %v359_v41  ;;  %1210 = vmatpush.bf16.msra.mxu0 %v1201_v45  ;;  %v371_v53 = vshrl.u32 %v327_v49, 16  ;;  %v374_v54 = vshll.u32 %v327_v49, 16  ;;  %v1637_v55 = vld [vmem:[%s1741_s29 + $0x4] sm:$0xf0]  ;;  %v1487_v60 = vld [vmem:[%s1741_s29 + $0x90] sm:$0xf] }
  0x19   : > { %v385_v57 = vshrl.u32 %v329_v50, 16  ;;  %v388_v58 = vshll.u32 %v329_v50, 16  ;;  %v1645_v61 = vld [vmem:[%s1741_s29 + $0x94] sm:$0xf0]  ;;  %v1649_v3 = vld [vmem:[%s1741_s29 + $0xdc] sm:$0xf0]  ;;  %v1454_v9 = vor.u32 %v1637_v55, %v1453_v51 }
  0x1a   : > { %v350_v52 = vrot.slane %v349_v43, 4  ;;  %v364_v56 = vrot.slane %v363_v47, 4  ;;  %v373_v62 = vrot.slane %v371_v53, 4  ;;  %v376_v63 = vrot.slane %v374_v54, 5  ;;  %v1516_v2 = vld [vmem:[%s1741_s29 + $0xd8] sm:$0xf] }
  0x1b   : > { %v387_v4 = vrot.slane %v385_v57, 4  ;;  %v390_v5 = vrot.slane %v388_v58, 5  ;;  %v328_v7 = vld [vmem:[%s1741_s29 + $0x14] sm:$0x1]  ;;  %v330_v8 = vld [vmem:[%s1741_s29 + $0x1c] sm:$0x1]  ;;  %v1488_v11 = vor.u32 %v1645_v61, %v1487_v60  ;;  %v1517_v12 = vor.u32 %v1649_v3, %v1516_v2 }
  0x1c   : > { %v355_v59 = vsel %vm1772_vm4, %v350_v52, %v354_v44  ;;  %v369_v0 = vsel %vm1772_vm4, %v364_v56, %v368_v48  ;;  %v377_v13 = vor.u32 %v376_v63, %v373_v62  ;;  %v380_v14 = vshll.u32 %v328_v7, 16  ;;  %v331_v21 = vld [vmem:[%s1741_s29 + $0x20] sm:$0xf]  ;;  %v333_v22 = vld [vmem:[%s1741_s29 + $0x28] sm:$0xf]  ;;  %s1636_s11 = sshll.u32 %s2033_s13, 6 }
  0x1d   : > { %v456_v1 = vunpack.c.l.b16 %v355_v59  ;;  %v457_v6 = vunpack.c.l.b16 %v369_v0  ;;  %v391_v15 = vor.u32 %v390_v5, %v387_v4  ;;  %v394_v16 = vshll.u32 %v330_v8, 16  ;;  %v1457_v29 = vld [vmem:[%s1741_s29 + $0x10] sm:$0xf]  ;;  %v1638_v30 = vld [vmem:[%s1741_s29 + $0x14] sm:$0xf0]  ;;  %s170_s15 = scalar_lea.vmem %s2029_s3, %s1636_s11 }
  0x1e   : > { %v378_v17 = vrot.slane %v377_v13, 4  ;;  %v382_v18 = vrot.slane %v380_v14, 5  ;;  %v399_v23 = vshrl.u32 %v331_v21, 16  ;;  %v402_v24 = vshll.u32 %v331_v21, 16  ;;  %v1491_v33 = vld [vmem:[%s1741_s29 + $0xa0] sm:$0xf] }
  0x1f   : > { %v464_v10 = vpack.c.b16 %v457_v6, %v456_v1  ;;  %v392_v19 = vrot.slane %v391_v15, 4  ;;  %v396_v20 = vrot.slane %v394_v16, 5  ;;  %v413_v27 = vshrl.u32 %v333_v22, 16  ;;  %v1646_v34 = vld [vmem:[%s1741_s29 + $0xa4] sm:$0xf0] }
  0x20   : > { %v383_v25 = vsel %vm1772_vm4, %v378_v17, %v382_v18  ;;  %v416_v28 = vshll.u32 %v333_v22, 16  ;;  %v1520_v35 = vld [vmem:[%s1741_s29 + $0xe8] sm:$0xf]  ;;  %v1650_v36 = vld [vmem:[%s1741_s29 + $0xec] sm:$0xf0]  ;;  %v401_v37 = vrot.slane %v399_v23, 4  ;;  %v1458_v43 = vor.u32 %v1638_v30, %v1457_v29 }
  0x21   : > { %v397_v26 = vsel %vm1772_vm4, %v392_v19, %v396_v20  ;;  %v458_v31 = vunpack.c.l.b16 %v383_v25  ;;  %v404_v38 = vrot.slane %v402_v24, 5  ;;  %v415_v39 = vrot.slane %v413_v27, 4  ;;  %v332_v41 = vld [vmem:[%s1741_s29 + $0x24] sm:$0x1]  ;;  %v334_v42 = vld [vmem:[%s1741_s29 + $0x2c] sm:$0x1] }
  0x22   : > { %v459_v32 = vunpack.c.l.b16 %v397_v26  ;;  %v418_v40 = vrot.slane %v416_v28, 5  ;;  %v1492_v45 = vor.u32 %v1646_v34, %v1491_v33  ;;  %v1521_v47 = vor.u32 %v1650_v36, %v1520_v35  ;;  %v335_v52 = vld [vmem:[%s1741_s29 + $0x30] sm:$0xf]  ;;  %v337_v53 = vld [vmem:[%s1741_s29 + $0x38] sm:$0xf] }
  0x23   : > { %1467 = vmatmul.msk.bf16.vlgmr.msrb.gmra.mxu1 %vm213_vm1, %v1454_v9  ;;  %v405_v48 = vor.u32 %v404_v38, %v401_v37  ;;  %v408_v49 = vshll.u32 %v332_v41, 16  ;;  %v422_v51 = vshll.u32 %v334_v42, 16  ;;  %v427_v58 = vshrl.u32 %v335_v52, 16  ;;  %v336_v4 = vld [vmem:[%s1741_s29 + $0x34] sm:$0x1] }
  0x24   : > { %1472 = vmatmul.msk.bf16.vlgmr.msrb.gmra.mxu2 %vm213_vm1, %v464_v10  ;;  %1501 = vmatmul.msk.bf16.vlgmr.msrb.gmra.mxu3 %vm213_vm1, %v1488_v11  ;;  %v465_v44 = vpack.c.b16 %v459_v32, %v458_v31  ;;  %v419_v50 = vor.u32 %v418_v40, %v415_v39  ;;  %v430_v59 = vshll.u32 %v335_v52, 16  ;;  %v441_v60 = vshrl.u32 %v337_v53, 16  ;;  %v338_v5 = vld [vmem:[%s1741_s29 + $0x3c] sm:$0x1]  ;;  %v1461_v6 = vld [vmem:[%s1741_s29 + $0x20] sm:$0xf] }
  0x25   : > { %1530 = vmatmul.msk.bf16.vlgmr.msrb.gmra.mxu0 %vm213_vm1, %v1517_v12  ;;  %v406_v54 = vrot.slane %v405_v48, 4  ;;  %v410_v55 = vrot.slane %v408_v49, 5  ;;  %v424_v57 = vrot.slane %v422_v51, 5  ;;  %v444_v61 = vshll.u32 %v337_v53, 16  ;;  %v1639_v7 = vld [vmem:[%s1741_s29 + $0x24] sm:$0xf0] }
  0x26   : > { %v420_v56 = vrot.slane %v419_v50, 4  ;;  %v429_v0 = vrot.slane %v427_v58, 4  ;;  %v432_v1 = vrot.slane %v430_v59, 5  ;;  %v443_v2 = vrot.slane %v441_v60, 4  ;;  %v1495_v10 = vld [vmem:[%s1741_s29 + $0xb0] sm:$0xf] }
  0x27   : > { %v411_v62 = vsel %vm1772_vm4, %v406_v54, %v410_v55  ;;  %v446_v3 = vrot.slane %v444_v61, 5  ;;  %v1647_v11 = vld [vmem:[%s1741_s29 + $0xb4] sm:$0xf0]  ;;  %v1651_v13 = vld [vmem:[%s1741_s29 + $0xfc] sm:$0xf0]  ;;  %v436_v15 = vshll.u32 %v336_v4, 16  ;;  %v1462_v18 = vor.u32 %v1639_v7, %v1461_v6 }
  0x28   : > { %v425_v63 = vsel %vm1772_vm4, %v420_v56, %v424_v57  ;;  %v460_v8 = vunpack.c.l.b16 %v411_v62  ;;  %v1524_v12 = vld [vmem:[%s1741_s29 + $0xf8] sm:$0xf]  ;;  %v433_v14 = vor.u32 %v432_v1, %v429_v0  ;;  %v450_v17 = vshll.u32 %v338_v5, 16  ;;  %v1534_v26 = vld [vmem:[%s1741_s29 + $0x90] sm:$0xf] }
  0x29   : > { %v461_v9 = vunpack.c.l.b16 %v425_v63  ;;  %v447_v16 = vor.u32 %v446_v3, %v443_v2  ;;  %v1496_v20 = vor.u32 %v1647_v11, %v1495_v10  ;;  %v1525_v21 = vor.u32 %v1651_v13, %v1524_v12  ;;  %v1536_v27 = vld [vmem:[%s1741_s29 + $0x98] sm:$0xf]  ;;  %v1613_v28 = vld [vmem:[%s1741_s29 + $0x8] sm:$0xf]  ;;  %v1615_v29 = vld [vmem:[%s1741_s29 + $0x10] sm:$0xf] }
  0x2a   : > { %v434_v22 = vrot.slane %v433_v14, 4  ;;  %v438_v23 = vrot.slane %v436_v15, 5  ;;  %v452_v25 = vrot.slane %v450_v17, 5  ;;  %v703_v32 = vshrl.u32 %v1534_v26, 16  ;;  %v1465_v40 = vld [vmem:[%s1741_s29 + $0x30] sm:$0xf] }
  0x2b   : > { %v466_v19 = vpack.c.b16 %v461_v9, %v460_v8  ;;  %v448_v24 = vrot.slane %v447_v16, 4  ;;  %v706_v33 = vshll.u32 %v1534_v26, 16  ;;  %v717_v34 = vshrl.u32 %v1536_v27, 16  ;;  %v1640_v41 = vld [vmem:[%s1741_s29 + $0x34] sm:$0xf0] }
  0x2c   : > { %v439_v30 = vsel %vm1772_vm4, %v434_v22, %v438_v23  ;;  %v720_v35 = vshll.u32 %v1536_v27, 16  ;;  %v1063_v36 = vshrl.u32 %v1613_v28, 16  ;;  %v1066_v37 = vshll.u32 %v1613_v28, 16  ;;  %v1537_v52 = vld [vmem:[%s1741_s29 + $0x9c] sm:$0x1] }
  0x2d   : > { %v453_v31 = vsel %vm1772_vm4, %v448_v24, %v452_v25  ;;  %v1077_v38 = vshrl.u32 %v1615_v29, 16  ;;  %v1080_v39 = vshll.u32 %v1615_v29, 16  ;;  %v462_v42 = vunpack.c.l.b16 %v439_v30  ;;  %v1614_v57 = vld [vmem:[%s1741_s29 + $0xc] sm:$0x1]  ;;  %v1616_v58 = vld [vmem:[%s1741_s29 + $0x14] sm:$0x1] }
  0x2e   : > { %v705_v48 = vrot.slane %v703_v32, 4  ;;  %v708_v49 = vrot.slane %v706_v33, 5  ;;  %v719_v50 = vrot.slane %v717_v34, 4  ;;  %v722_v51 = vrot.slane %v720_v35, 5  ;;  %v1528_v62 = vld [vmem:[%s1741_s29 + $0x108] sm:$0xf] }
  0x2f   : > { %v1065_v53 = vrot.slane %v1063_v36, 4  ;;  %v1068_v54 = vrot.slane %v1066_v37, 5  ;;  %v1079_v55 = vrot.slane %v1077_v38, 4  ;;  %v1082_v56 = vrot.slane %v1080_v39, 5  ;;  %v1652_v63 = vld [vmem:[%s1741_s29 + $0x10c] sm:$0xf0] }
  0x30   : > { %v1466_v59 = vor.u32 %v1640_v41, %v1465_v40  ;;  %v709_v0 = vor.u32 %v708_v49, %v705_v48  ;;  %v723_v2 = vor.u32 %v722_v51, %v719_v50  ;;  %v726_v3 = vshll.u32 %v1537_v52, 16  ;;  %v1538_v9 = vld [vmem:[%s1741_s29 + $0xa0] sm:$0xf]  ;;  %v1540_v10 = vld [vmem:[%s1741_s29 + $0xa8] sm:$0xf] }
  0x31   : > { %v1069_v4 = vor.u32 %v1068_v54, %v1065_v53  ;;  %v1072_v5 = vshll.u32 %v1614_v57, 16  ;;  %v1083_v6 = vor.u32 %v1082_v56, %v1079_v55  ;;  %v1086_v7 = vshll.u32 %v1616_v58, 16  ;;  %v1617_v23 = vld [vmem:[%s1741_s29 + $0x18] sm:$0xf]  ;;  %v1619_v24 = vld [vmem:[%s1741_s29 + $0x20] sm:$0xf] }
  0x32   : > { %v1529_v8 = vor.u32 %v1652_v63, %v1528_v62  ;;  %v710_v11 = vrot.slane %v709_v0, 4  ;;  %v724_v13 = vrot.slane %v723_v2, 4  ;;  %v728_v14 = vrot.slane %v726_v3, 5  ;;  %v1539_v29 = vld [vmem:[%s1741_s29 + $0xa4] sm:$0x1] }
  0x33   : > { %1468 = vmatmul.msk.bf16.gmra.mxu1 %vm213_vm1, %v1458_v43  ;;  %v463_v43 = vunpack.c.l.b16 %v453_v31  ;;  %v1070_v15 = vrot.slane %v1069_v4, 4  ;;  %v1074_v16 = vrot.slane %v1072_v5, 5  ;;  %v1084_v17 = vrot.slane %v1083_v6, 4  ;;  %v1541_v34 = vld [vmem:[%s1741_s29 + $0xac] sm:$0x1] }
  0x34   : > { %1473 = vmatmul.msk.bf16.gmra.mxu2 %vm213_vm1, %v465_v44  ;;  %1502 = vmatmul.msk.bf16.gmra.mxu3 %vm213_vm1, %v1492_v45  ;;  %v1499_v44 = vld [vmem:[%s1741_s29 + $0xc0] sm:$0xf]  ;;  %v1648_v45 = vld [vmem:[%s1741_s29 + $0xc4] sm:$0xf0]  ;;  %v748_v22 = vshll.u32 %v1540_v10, 16  ;;  %v729_v26 = vsel %vm1772_vm4, %v724_v13, %v728_v14  ;;  %v1091_v35 = vshrl.u32 %v1617_v23, 16 }
  0x35   : > { %1531 = vmatmul.msk.bf16.gmra.mxu0 %vm213_vm1, %v1521_v47  ;;  %v1535_v47 = vld [vmem:[%s1741_s29 + $0x94] sm:$0x1]  ;;  %v467_v60 = vpack.c.b16 %v463_v43, %v462_v42  ;;  %v1500_v61 = vor.u32 %v1648_v45, %v1499_v44  ;;  %v1075_v27 = vsel %vm1772_vm4, %v1070_v15, %v1074_v16  ;;  %v1094_v36 = vshll.u32 %v1617_v23, 16  ;;  %v1566_v41 = vld [vmem:[%s1741_s29 + $0x8] sm:$0xf] }
  0x36   : > { %v712_v1 = vshll.u32 %v1535_v47, 16  ;;  %v750_v33 = vrot.slane %v748_v22, 5  ;;  %v1105_v37 = vshrl.u32 %v1619_v24, 16  ;;  %v1108_v38 = vshll.u32 %v1619_v24, 16  ;;  %v1653_v42 = vld [vmem:[%s1741_s29 + $0xc] sm:$0xf0] }
  0x37   : > { %v817_v40 = vunpack.c.l.b16 %v729_v26  ;;  %v1176_v43 = vunpack.c.l.b16 %v1075_v27  ;;  %v1595_v45 = vld [vmem:[%s1741_s29 + $0x50] sm:$0xf]  ;;  %v1657_v47 = vld [vmem:[%s1741_s29 + $0x54] sm:$0xf0]  ;;  %v740_v49 = vshll.u32 %v1539_v29, 16  ;;  %v754_v51 = vshll.u32 %v1541_v34, 16 }
  0x38   : > { %v714_v12 = vrot.slane %v712_v1, 5  ;;  %v1093_v52 = vrot.slane %v1091_v35, 4  ;;  %v1096_v53 = vrot.slane %v1094_v36, 5  ;;  %v1107_v54 = vrot.slane %v1105_v37, 4  ;;  %v1618_v57 = vld [vmem:[%s1741_s29 + $0x1c] sm:$0x1] }
  0x39   : > { %v1110_v55 = vrot.slane %v1108_v38, 5  ;;  %v1620_v58 = vld [vmem:[%s1741_s29 + $0x24] sm:$0x1]  ;;  %v742_v63 = vrot.slane %v740_v49, 5  ;;  %v756_v1 = vrot.slane %v754_v51, 5  ;;  %v1100_v3 = vshll.u32 %v1618_v57, 16 }
  0x3a   : > { %v715_v25 = vsel %vm1772_vm4, %v710_v11, %v714_v12  ;;  %v1097_v2 = vor.u32 %v1096_v53, %v1093_v52  ;;  %v1114_v5 = vshll.u32 %v1620_v58, 16  ;;  %v1542_v6 = vld [vmem:[%s1741_s29 + $0xb0] sm:$0xf]  ;;  %v1654_v29 = vld [vmem:[%s1741_s29 + $0x1c] sm:$0xf0] }
  0x3b   : > { %v816_v39 = vunpack.c.l.b16 %v715_v25  ;;  %v1111_v4 = vor.u32 %v1110_v55, %v1107_v54  ;;  %v1102_v12 = vrot.slane %v1100_v3, 5  ;;  %v1623_v15 = vld [vmem:[%s1741_s29 + $0x30] sm:$0xf]  ;;  %v759_v16 = vshrl.u32 %v1542_v6, 16  ;;  %v1543_v35 = vld [vmem:[%s1741_s29 + $0xb4] sm:$0x1] }
  0x3c   : > { %v1098_v11 = vrot.slane %v1097_v2, 4  ;;  %v1116_v14 = vrot.slane %v1114_v5, 5  ;;  %v1133_v22 = vshrl.u32 %v1623_v15, 16  ;;  %v1136_v23 = vshll.u32 %v1623_v15, 16  ;;  %v1545_v36 = vld [vmem:[%s1741_s29 + $0xbc] sm:$0x1] }
  0x3d   : > { %v824_v56 = vpack.c.b16 %v817_v40, %v816_v39  ;;  %v1112_v13 = vrot.slane %v1111_v4, 4  ;;  %v1658_v39 = vld [vmem:[%s1741_s29 + $0x64] sm:$0xf0]  ;;  %v768_v49 = vshll.u32 %v1543_v35, 16  ;;  %v782_v51 = vshll.u32 %v1545_v36, 16 }
  0x3e   : > { %v1103_v26 = vsel %vm1772_vm4, %v1098_v11, %v1102_v12  ;;  %v1546_v3 = vld [vmem:[%s1741_s29 + $0xc0] sm:$0xf]  ;;  %v1548_v4 = vld [vmem:[%s1741_s29 + $0xc8] sm:$0xf] }
  0x3f   : > { %v1117_v27 = vsel %vm1772_vm4, %v1112_v13, %v1116_v14  ;;  %v1178_v40 = vunpack.c.l.b16 %v1103_v26  ;;  %v801_v11 = vshrl.u32 %v1548_v4, 16  ;;  %v804_v12 = vshll.u32 %v1548_v4, 16  ;;  %v1607_v4 = vld [vmem:[%s1741_s29 + $0x80] sm:$0xf] }
  0x43   : > { %1469 = vmatmul.msk.bf16.gmra.mxu1 %vm213_vm1, %v1462_v18  ;;  %v1088_v18 = vrot.slane %v1086_v7, 5  ;;  %v1544_v7 = vld [vmem:[%s1741_s29 + $0xb8] sm:$0xf] }
  0x44   : > { %1474 = vmatmul.msk.bf16.gmra.mxu2 %vm213_vm1, %v466_v19  ;;  %1503 = vmatmul.msk.bf16.gmra.mxu3 %vm213_vm1, %v1496_v20  ;;  %v731_v19 = vshrl.u32 %v1538_v9, 16  ;;  %v734_v20 = vshll.u32 %v1538_v9, 16 }
  0x45   : > { %1532 = vmatmul.msk.bf16.gmra.mxu0 %vm213_vm1, %v1525_v21  ;;  %v745_v21 = vshrl.u32 %v1540_v10, 16  ;;  %v1089_v28 = vsel %vm1772_vm4, %v1084_v17, %v1088_v18  ;;  %v1621_v10 = vld [vmem:[%s1741_s29 + $0x28] sm:$0xf]  ;;  %v762_v17 = vshll.u32 %v1542_v6, 16  ;;  %v773_v18 = vshrl.u32 %v1544_v7, 16 }
  0x46   : > { %v733_v30 = vrot.slane %v731_v19, 4  ;;  %v736_v31 = vrot.slane %v734_v20, 5  ;;  %v1177_v44 = vunpack.c.l.b16 %v1089_v28  ;;  %v776_v19 = vshll.u32 %v1544_v7, 16  ;;  %v1570_v28 = vld [vmem:[%s1741_s29 + $0x18] sm:$0xf] }
  0x47   : > { %v747_v32 = vrot.slane %v745_v21, 4  ;;  %v1119_v20 = vshrl.u32 %v1621_v10, 16  ;;  %v1122_v21 = vshll.u32 %v1621_v10, 16  ;;  %v1571_v52 = vor.u32 %v1654_v29, %v1570_v28  ;;  %v1625_v7 = vld [vmem:[%s1741_s29 + $0x38] sm:$0xf] }
  0x48   : > { %v737_v48 = vor.u32 %v736_v31, %v733_v30  ;;  %v1599_v30 = vld [vmem:[%s1741_s29 + $0x60] sm:$0xf]  ;;  %v761_v31 = vrot.slane %v759_v16, 4  ;;  %v778_v34 = vrot.slane %v776_v19, 5  ;;  %v790_v10 = vshll.u32 %v1546_v3, 16 }
  0x49   : > { %v751_v50 = vor.u32 %v750_v33, %v747_v32  ;;  %v764_v32 = vrot.slane %v762_v17, 5  ;;  %v775_v33 = vrot.slane %v773_v18, 4  ;;  %v1121_v37 = vrot.slane %v1119_v20, 4 }
  0x4a   : > { %v738_v62 = vrot.slane %v737_v48, 4  ;;  %v1124_v38 = vrot.slane %v1122_v21, 5  ;;  %v1600_v53 = vor.u32 %v1658_v39, %v1599_v30  ;;  %v1147_v15 = vshrl.u32 %v1625_v7, 16  ;;  %v1574_v21 = vld [vmem:[%s1741_s29 + $0x28] sm:$0xf] }
  0x4b   : > { %v752_v0 = vrot.slane %v751_v50, 4  ;;  %v765_v48 = vor.u32 %v764_v32, %v761_v31  ;;  %v779_v50 = vor.u32 %v778_v34, %v775_v33  ;;  %v1150_v16 = vshll.u32 %v1625_v7, 16  ;;  %v1547_v31 = vld [vmem:[%s1741_s29 + $0xc4] sm:$0x1]  ;;  %v1549_v32 = vld [vmem:[%s1741_s29 + $0xcc] sm:$0x1] }
  0x4c   : > { %v1125_v54 = vor.u32 %v1124_v38, %v1121_v37  ;;  %v792_v26 = vrot.slane %v790_v10, 5  ;;  %v806_v28 = vrot.slane %v804_v12, 5  ;;  %v1149_v33 = vrot.slane %v1147_v15, 4 }
  0x4d   : > { %v757_v9 = vsel %vm1772_vm4, %v752_v0, %v756_v1  ;;  %v1152_v34 = vrot.slane %v1150_v16, 5 }
  0x4e   : > { %v819_v25 = vunpack.c.l.b16 %v757_v9  ;;  %v787_v9 = vshrl.u32 %v1546_v3, 16  ;;  %v1656_v3 = vld [vmem:[%s1741_s29 + $0x3c] sm:$0xf0] }
  0x53   : > { %1470 = vmatmul.msk.bf16.gmra.mxu1 %vm213_vm1, %v1466_v59  ;;  %v1567_v59 = vor.u32 %v1653_v42, %v1566_v41  ;;  %v1179_v41 = vunpack.c.l.b16 %v1117_v27  ;;  %v1622_v42 = vld [vmem:[%s1741_s29 + $0x2c] sm:$0x1]  ;;  %v803_v27 = vrot.slane %v801_v11, 4 }
  0x54   : > { %1475 = vmatmul.msk.bf16.gmra.mxu2 %vm213_vm1, %v467_v60  ;;  %1504 = vmatmul.msk.bf16.gmra.mxu3 %vm213_vm1, %v1500_v61  ;;  %v1596_v60 = vor.u32 %v1657_v47, %v1595_v45  ;;  %v1184_v61 = vpack.c.b16 %v1177_v44, %v1176_v43  ;;  %v1135_v43 = vrot.slane %v1133_v22, 4  ;;  %v1138_v44 = vrot.slane %v1136_v23, 5  ;;  %v1624_v47 = vld [vmem:[%s1741_s29 + $0x34] sm:$0x1]  ;;  %v1655_v22 = vld [vmem:[%s1741_s29 + $0x2c] sm:$0xf0] }
  0x55   : > { %1533 = vmatmul.msk.bf16.gmra.mxu0 %vm213_vm1, %v1529_v8  ;;  %v743_v8 = vsel %vm1772_vm4, %v738_v62, %v742_v63  ;;  %v1128_v55 = vshll.u32 %v1622_v42, 16  ;;  %v1142_v58 = vshll.u32 %v1624_v47, 16  ;;  %v784_v62 = vrot.slane %v782_v51, 5  ;;  %v1603_v23 = vld [vmem:[%s1741_s29 + $0x70] sm:$0xf] }
  0x56   : > { %v818_v24 = vunpack.c.l.b16 %v743_v8  ;;  %v1139_v57 = vor.u32 %v1138_v44, %v1135_v43  ;;  %v1126_v63 = vrot.slane %v1125_v54, 4  ;;  %v1627_v8 = vld [vmem:[%s1741_s29 + $0x40] sm:$0xf]  ;;  %v1575_v38 = vor.u32 %v1655_v22, %v1574_v21 }
  0x57   : > { %v1130_v0 = vrot.slane %v1128_v55, 5  ;;  %v1144_v2 = vrot.slane %v1142_v58, 5  ;;  %v1161_v17 = vshrl.u32 %v1627_v8, 16  ;;  %v1164_v18 = vshll.u32 %v1627_v8, 16 }
  0x58   : > { %v825_v45 = vpack.c.b16 %v819_v25, %v818_v24  ;;  %v1140_v1 = vrot.slane %v1139_v57, 4  ;;  %v1659_v24 = vld [vmem:[%s1741_s29 + $0x74] sm:$0xf0]  ;;  %v789_v25 = vrot.slane %v787_v9, 4  ;;  %v796_v43 = vshll.u32 %v1547_v31, 16 }
  0x59   : > { %v1131_v13 = vsel %vm1772_vm4, %v1126_v63, %v1130_v0  ;;  %v1163_v35 = vrot.slane %v1161_v17, 4  ;;  %v1166_v36 = vrot.slane %v1164_v18, 5  ;;  %v1604_v39 = vor.u32 %v1659_v24, %v1603_v23 }
  0x5a   : > { %v1145_v14 = vsel %vm1772_vm4, %v1140_v1, %v1144_v2  ;;  %v1180_v29 = vunpack.c.l.b16 %v1131_v13  ;;  %v793_v42 = vor.u32 %v792_v26, %v789_v25  ;;  %v807_v44 = vor.u32 %v806_v28, %v803_v27  ;;  %v1578_v2 = vld [vmem:[%s1741_s29 + $0x38] sm:$0xf] }
  0x5b   : > { %v1181_v30 = vunpack.c.l.b16 %v1145_v14  ;;  %v1579_v10 = vor.u32 %v1656_v3, %v1578_v2 }
  0x5c   : > { %v808_v54 = vrot.slane %v807_v44, 4 }
  0x5d   : > { %v1186_v47 = vpack.c.b16 %v1181_v30, %v1180_v29 }
  0x63   : > { %1551 = vmatmul.msk.bf16.vlgmr.msra.gmra.mxu1 %vm213_vm1, %v824_v56  ;;  %v1185_v56 = vpack.c.b16 %v1179_v41, %v1178_v40  ;;  %v1626_v40 = vld [vmem:[%s1741_s29 + $0x3c] sm:$0x1]  ;;  %v1628_v41 = vld [vmem:[%s1741_s29 + $0x44] sm:$0x1] }
  0x64   : > { %1580 = vmatmul.msk.bf16.vlgmr.msra.gmra.mxu2 %vm213_vm1, %v1567_v59  ;;  %1609 = vmatmul.msk.bf16.vlgmr.msra.gmra.mxu3 %vm213_vm1, %v1596_v60  ;;  %v766_v59 = vrot.slane %v765_v48, 4  ;;  %v770_v60 = vrot.slane %v768_v49, 5  ;;  %v1153_v48 = vor.u32 %v1152_v34, %v1149_v33  ;;  %v1156_v49 = vshll.u32 %v1626_v40, 16 }
  0x65   : > { %1630 = vmatmul.msk.bf16.vlgmr.msra.gmra.mxu0 %vm213_vm1, %v1184_v61  ;;  %v780_v61 = vrot.slane %v779_v50, 4  ;;  %v1167_v50 = vor.u32 %v1166_v36, %v1163_v35  ;;  %v1170_v51 = vshll.u32 %v1628_v41, 16 }
  0x66   : > { %v771_v5 = vsel %vm1772_vm4, %v766_v59, %v770_v60  ;;  %v1158_v57 = vrot.slane %v1156_v49, 5 }
  0x67   : > { %v785_v6 = vsel %vm1772_vm4, %v780_v61, %v784_v62  ;;  %v820_v19 = vunpack.c.l.b16 %v771_v5  ;;  %v1168_v58 = vrot.slane %v1167_v50, 4  ;;  %v1172_v59 = vrot.slane %v1170_v51, 5  ;;  %v1660_v5 = vld [vmem:[%s1741_s29 + $0x84] sm:$0xf0] }
  0x68   : > { %v821_v20 = vunpack.c.l.b16 %v785_v6  ;;  %v1608_v11 = vor.u32 %v1660_v5, %v1607_v4 }
  0x69   : > { %v1173_v63 = vsel %vm1772_vm4, %v1168_v58, %v1172_v59 }
  0x6a   : > { %v826_v37 = vpack.c.b16 %v821_v20, %v820_v19  ;;  %v1183_v7 = vunpack.c.l.b16 %v1173_v63 }
  0x73   : > { %1552 = vmatmul.msk.bf16.gmra.mxu1 %vm213_vm1, %v825_v45  ;;  %v810_v45 = vshll.u32 %v1549_v32, 16 }
  0x74   : > { %1581 = vmatmul.msk.bf16.gmra.mxu2 %vm213_vm1, %v1571_v52  ;;  %1610 = vmatmul.msk.bf16.gmra.mxu3 %vm213_vm1, %v1600_v53  ;;  %v794_v52 = vrot.slane %v793_v42, 4  ;;  %v798_v53 = vrot.slane %v796_v43, 5 }
  0x75   : > { %1631 = vmatmul.msk.bf16.gmra.mxu0 %vm213_vm1, %v1185_v56  ;;  %v812_v55 = vrot.slane %v810_v45, 5  ;;  %v1154_v56 = vrot.slane %v1153_v48, 4 }
  0x76   : > { %v799_v60 = vsel %vm1772_vm4, %v794_v52, %v798_v53 }
  0x77   : > { %v813_v61 = vsel %vm1772_vm4, %v808_v54, %v812_v55  ;;  %v1159_v62 = vsel %vm1772_vm4, %v1154_v56, %v1158_v57  ;;  %v822_v0 = vunpack.c.l.b16 %v799_v60 }
  0x78   : > { %v823_v1 = vunpack.c.l.b16 %v813_v61  ;;  %v1182_v6 = vunpack.c.l.b16 %v1159_v62 }
  0x7a   : > { %v827_v8 = vpack.c.b16 %v823_v1, %v822_v0  ;;  %v1187_v12 = vpack.c.b16 %v1183_v7, %v1182_v6 }
  0x83   : > { %1553 = vmatmul.msk.bf16.gmra.mxu1 %vm213_vm1, %v826_v37 }
  0x84   : > { %1582 = vmatmul.msk.bf16.gmra.mxu2 %vm213_vm1, %v1575_v38  ;;  %1611 = vmatmul.msk.bf16.gmra.mxu3 %vm213_vm1, %v1604_v39 }
  0x85   : > { %1632 = vmatmul.msk.bf16.gmra.mxu0 %vm213_vm1, %v1186_v47 }
  0x90   : > { %v244_v9 = vpop.f32.mrf.mxu1 }
  0x92   : > { %v239_v13 = vpop.f32.mrf.mxu0 }
  0x93   : > { %1554 = vmatmul.msk.bf16.gmra.mxu1 %vm213_vm1, %v827_v8 }
  0x94   : > { %1583 = vmatmul.msk.bf16.gmra.mxu2 %vm213_vm1, %v1579_v10  ;;  %1612 = vmatmul.msk.bf16.gmra.mxu3 %vm213_vm1, %v1608_v11 }
  0x95   : > { %1633 = vmatmul.msk.bf16.gmra.mxu0 %vm213_vm1, %v1187_v12 }
  0x97   : > { %v249_v46 = vpop.f32.mrf.mxu2  ;;  %v1940_v14 = vpop.f32.mrf.mxu3 }
  0x98   : > { %v246_v15 = vpop.f32.mrf.mxu1 }
  0x9a   : > { %v241_v16 = vpop.f32.mrf.mxu0 }
  0x9f   : > { %v251_v17 = vpop.f32.mrf.mxu2  ;;  %v1942_v18 = vpop.f32.mrf.mxu3 }
  0xa0   : > { %v303_v19 = vpop.f32.mrf.mxu1 }
  0xa1   : > { %v304_v20 = vadd.f32 %v303_v19, %v239_v13 }
  0xa2   : > { %v658_v21 = vpop.f32.mrf.mxu0 }
  0xa7   : > { %v492_v22 = vpop.f32.mrf.mxu2  ;;  %v575_v23 = vpop.f32.mrf.mxu3 }
  0xa8   : > { %v512_v24 = vadd.f32 %v492_v22, %v304_v20  ;;  %v305_v25 = vpop.f32.mrf.mxu1 }
  0xa9   : > { %v306_v26 = vadd.f32 %v305_v25, %v241_v16 }
  0xaa   : > { %v595_v27 = vadd.f32 %v575_v23, %v512_v24  ;;  %v660_v28 = vpop.f32.mrf.mxu0 }
  0xac   : > { %v1944_v29 = vadd.f32 %v658_v21, %v595_v27 }
  0xaf   : > { %v494_v30 = vpop.f32.mrf.mxu2  ;;  %v577_v31 = vpop.f32.mrf.mxu3 }
  0xb0   : > { %v513_v32 = vadd.f32 %v494_v30, %v306_v26  ;;  %v308_v33 = vpop.f32.mrf.mxu1 }
  0xb1   : > { %v309_v34 = vadd.f32 %v308_v33, %v244_v9 }
  0xb2   : > { %v596_v35 = vadd.f32 %v577_v31, %v513_v32  ;;  %v663_v36 = vpop.f32.mrf.mxu0 }
  0xb4   : > { %v679_v37 = vadd.f32 %v660_v28, %v596_v35 }
  0xb7   : > { %v497_v38 = vpop.f32.mrf.mxu2  ;;  %v580_v39 = vpop.f32.mrf.mxu3 }
  0xb8   : > { %v514_v40 = vadd.f32 %v497_v38, %v309_v34  ;;  %v310_v41 = vpop.f32.mrf.mxu1 }
  0xb9   : > { %v311_v42 = vadd.f32 %v310_v41, %v246_v15 }
  0xba   : > { %v597_v43 = vadd.f32 %v580_v39, %v514_v40  ;;  %v665_v44 = vpop.f32.mrf.mxu0 }
  0xbc   : > { %v680_v45 = vadd.f32 %v663_v36, %v597_v43 }
  0xbf   : > { %v499_v47 = vpop.f32.mrf.mxu2  ;;  %v582_v48 = vpop.f32.mrf.mxu3 }
  0xc0   : > { %v515_v49 = vadd.f32 %v499_v47, %v311_v42  ;;  %v313_v50 = vpop.f32.mrf.mxu1 }
  0xc1   : > { %v314_v51 = vadd.f32 %v313_v50, %v249_v46 }
  0xc2   : > { %v598_v52 = vadd.f32 %v582_v48, %v515_v49  ;;  %v668_v53 = vpop.f32.mrf.mxu0 }
  0xc4   : > { %v681_v54 = vadd.f32 %v665_v44, %v598_v52 }
  0xc7   : > { %v502_v55 = vpop.f32.mrf.mxu2  ;;  %v585_v56 = vpop.f32.mrf.mxu3 }
  0xc8   : > { %v516_v57 = vadd.f32 %v502_v55, %v314_v51  ;;  %v315_v58 = vpop.f32.mrf.mxu1 }
  0xc9   : > { %v316_v59 = vadd.f32 %v315_v58, %v251_v17 }
  0xca   : > { %v599_v60 = vadd.f32 %v585_v56, %v516_v57  ;;  %v670_v61 = vpop.f32.mrf.mxu0 }
  0xcc   : > { %v682_v62 = vadd.f32 %v668_v53, %v599_v60 }
  0xcf   : > { %v504_v63 = vpop.f32.mrf.mxu2  ;;  %v587_v0 = vpop.f32.mrf.mxu3 }
  0xd0   : > { %v517_v1 = vadd.f32 %v504_v63, %v316_v59  ;;  %v318_v2 = vpop.f32.mrf.mxu1 }
  0xd1   : > { %v319_v36 = vadd.f32 %v318_v2, %v1940_v14 }
  0xd2   : > { %v600_v3 = vadd.f32 %v587_v0, %v517_v1  ;;  %v673_v4 = vpop.f32.mrf.mxu0 }
  0xd4   : > { %v683_v5 = vadd.f32 %v670_v61, %v600_v3 }
  0xd7   : > { %v507_v6 = vpop.f32.mrf.mxu2  ;;  %v590_v7 = vpop.f32.mrf.mxu3 }
  0xd8   : > { %v320_v8 = vpop.f32.mrf.mxu1  ;;  %v518_v41 = vadd.f32 %v507_v6, %v319_v36 }
  0xd9   : > { %v321_v14 = vadd.f32 %v320_v8, %v1942_v18 }
  0xda   : > { %v1946_v9 = vpop.f32.mrf.mxu0  ;;  %v601_v51 = vadd.f32 %v590_v7, %v518_v41 }
  0xdc   : > { %v684_v0 = vadd.f32 %v673_v4, %v601_v51 }
  0xdf   : > { %v509_v10 = vpop.f32.mrf.mxu2  ;;  %v592_v11 = vpop.f32.mrf.mxu3 }
  0xe0   : > { %v852_v12 = vpop.f32.mrf.mxu1  ;;  %v519_v60 = vadd.f32 %v509_v10, %v321_v14 }
  0xe1   : > { %v872_v38 = vadd.f32 %v852_v12, %v1944_v29 }
  0xe2   : > { %v1212_v13 = vpop.f32.mrf.mxu0  ;;  %v602_v6 = vadd.f32 %v592_v11, %v519_v60 }
  0xe7   : > { %v935_v46 = vpop.f32.mrf.mxu2  ;;  %v1018_v15 = vpop.f32.mrf.mxu3 }
  0xe8   : > { %v854_v16 = vpop.f32.mrf.mxu1  ;;  %v955_v42 = vadd.f32 %v935_v46, %v872_v38 }
  0xe9   : > { %v873_v34 = vadd.f32 %v854_v16, %v679_v37 }
  0xea   : > { %v1214_v17 = vpop.f32.mrf.mxu0  ;;  %v1038_v55 = vadd.f32 %v1018_v15, %v955_v42 }
  0xec   : > { %v1232_v61 = vadd.f32 %v1212_v13, %v1038_v55 }
  0xef   : > { %v937_v19 = vpop.f32.mrf.mxu2  ;;  %v1020_v20 = vpop.f32.mrf.mxu3 }
  0xf0   : > { %v857_v21 = vpop.f32.mrf.mxu1  ;;  %v956_v39 = vadd.f32 %v937_v19, %v873_v34  ;;  %v685_v19 = vadd.f32 %v1946_v9, %v602_v6 }
  0xf1   : > { %v874_v40 = vadd.f32 %v857_v21, %v680_v45 }
  0xf2   : > { %v1217_v22 = vpop.f32.mrf.mxu0  ;;  %v1039_v47 = vadd.f32 %v1020_v20, %v956_v39 }
  0xf4   : > { %v1233_v58 = vadd.f32 %v1214_v17, %v1039_v47 }
  0xf7   : > { %v940_v23 = vpop.f32.mrf.mxu2  ;;  %v1023_v24 = vpop.f32.mrf.mxu3 }
  0xf8   : > { %v859_v25 = vpop.f32.mrf.mxu1  ;;  %v957_v43 = vadd.f32 %v940_v23, %v874_v40 }
  0xf9   : > { %v875_v44 = vadd.f32 %v859_v25, %v681_v54  ;;  %v1673_v54 = vld [vmem:[%s2028_s2] ss:$0 sm:$0xff] }
  0xfa   : > { %v1219_v26 = vpop.f32.mrf.mxu0  ;;  %v1040_v37 = vadd.f32 %v1023_v24, %v957_v43  ;;  %v1954_v1 = vadd.f32 %v1673_v54, %v1233_v58  ;;  %v1956_v8 = vadd.f32 %v1673_v54, %v1232_v61 }
  0xfc   : > { %v1253_v15 = vsel %vm1251_vm5, %v1954_v1, 0.0  ;;  %v1252_v20 = vsel %vm1251_vm5, %v1956_v8, 0.0 }
  0xfd   : > { %v1254_v24 = vadd.f32 %v1253_v15, %v1252_v20 }
  0xff   : > { %v942_v27 = vpop.f32.mrf.mxu2  ;;  %v1025_v28 = vpop.f32.mrf.mxu3 }
 0x100   : > { %v862_v30 = vpop.f32.mrf.mxu1  ;;  %v958_v48 = vadd.f32 %v942_v27, %v875_v44 }
 0x101   : > { %v876_v49 = vadd.f32 %v862_v30, %v682_v62  ;;  %v1234_v62 = vadd.f32 %v1217_v22, %v1040_v37 }
 0x102   : > { %v1222_v31 = vpop.f32.mrf.mxu0  ;;  %v1041_v45 = vadd.f32 %v1025_v28, %v958_v48 }
 0x103   : > { %v1958_v12 = vadd.f32 %v1673_v54, %v1234_v62 }
 0x104   : > { %v1235_v2 = vadd.f32 %v1219_v26, %v1041_v45 }
 0x105   : > { %v1255_v21 = vsel %vm1251_vm5, %v1958_v12, 0.0 }
 0x106   : > { %v1962_v4 = vadd.f32 %v1673_v54, %v1235_v2  ;;  %v1256_v28 = vadd.f32 %v1255_v21, %v1254_v24 }
 0x107   : > { %v945_v32 = vpop.f32.mrf.mxu2  ;;  %v1028_v33 = vpop.f32.mrf.mxu3 }
 0x108   : > { %v864_v35 = vpop.f32.mrf.mxu1  ;;  %v959_v56 = vadd.f32 %v945_v32, %v876_v49  ;;  %v1257_v25 = vsel %vm1251_vm5, %v1962_v4, 0.0 }
 0x109   : > { %v877_v57 = vadd.f32 %v864_v35, %v683_v5 }
 0x10a   : > { %v1224_v50 = vpop.f32.mrf.mxu0  ;;  %v1042_v63 = vadd.f32 %v1028_v33, %v959_v56  ;;  %v1258_v33 = vadd.f32 %v1257_v25, %v1256_v28 }
 0x10c   : > { %v1236_v10 = vadd.f32 %v1222_v31, %v1042_v63 }
 0x10e   : > { %v1969_v22 = vadd.f32 %v1673_v54, %v1236_v10 }
 0x10f   : > { %v947_v52 = vpop.f32.mrf.mxu2  ;;  %v1030_v53 = vpop.f32.mrf.mxu3 }
 0x110   : > { %v867_v29 = vpop.f32.mrf.mxu1  ;;  %v960_v59 = vadd.f32 %v947_v52, %v877_v57  ;;  %v1259_v9 = vsel %vm1251_vm5, %v1969_v22, 0.0 }
 0x111   : > { %v878_v5 = vadd.f32 %v867_v29, %v684_v0  ;;  %v1260_v38 = vadd.f32 %v1259_v9, %v1258_v33 }
 0x112   : > { %v1043_v3 = vadd.f32 %v1030_v53, %v960_v59  ;;  %v1227_v46 = vpop.f32.mrf.mxu0 }
 0x114   : > { %v1237_v16 = vadd.f32 %v1224_v50, %v1043_v3 }
 0x116   : > { %v1973_v26 = vadd.f32 %v1673_v54, %v1237_v16 }
 0x117   : > { %v950_v18 = vpop.f32.mrf.mxu2  ;;  %v1033_v7 = vpop.f32.mrf.mxu3 }
 0x118   : > { %v961_v13 = vadd.f32 %v950_v18, %v878_v5  ;;  %v869_v11 = vpop.f32.mrf.mxu1  ;;  %v1261_v35 = vsel %vm1251_vm5, %v1973_v26, 0.0 }
 0x119   : > { %v879_v27 = vadd.f32 %v869_v11, %v685_v19  ;;  %v1262_v42 = vadd.f32 %v1261_v35, %v1260_v38 }
 0x11a   : > { %v1044_v17 = vadd.f32 %v1033_v7, %v961_v13  ;;  %v1229_v39 = vpop.f32.mrf.mxu0 }
 0x11c   : > { %v1238_v23 = vadd.f32 %v1227_v46, %v1044_v17 }
 0x11e   : > { %v1977_v31 = vadd.f32 %v1673_v54, %v1238_v23 }
 0x11f   : > { %v952_v30 = vpop.f32.mrf.mxu2  ;;  %v1035_v34 = vpop.f32.mrf.mxu3 }
 0x120   : > { %v962_v32 = vadd.f32 %v952_v30, %v879_v27  ;;  %v1263_v40 = vsel %vm1251_vm5, %v1977_v31, 0.0 }
 0x121   : > { %v1264_v44 = vadd.f32 %v1263_v40, %v1262_v42 }
 0x122   : > { %v1045_v36 = vadd.f32 %v1035_v34, %v962_v32 }
 0x124   : > { %v1239_v41 = vadd.f32 %v1229_v39, %v1045_v36 }
 0x126   : > { %v1983_v43 = vadd.f32 %v1673_v54, %v1239_v41 }
 0x128   : > { %v1265_v47 = vsel %vm1251_vm5, %v1983_v43, 0.0 }
 0x129   : > { %v1266_v48 = vadd.f32 %v1265_v47, %v1264_v44 }
 0x12b   : > { %v1267_v49 = vrot.slane %v1266_v48, 4 }
 0x12d   : > { %v1268_v50 = vadd.f32 %v1267_v49, %v1266_v48 }
 0x12f   : > { %v1269_v51 = vrot.slane %v1268_v50, 2 }
 0x131   : > { %v1270_v52 = vadd.f32 %v1269_v51, %v1268_v50 }
 0x133   : > { %v1271_v53 = vrot.slane %v1270_v52, 1 }
 0x135   : > { %v1272_v55 = vadd.f32 %v1271_v53, %v1270_v52 }
 0x137   : > { %v1274_v37 = vmul.f32 0.015625, %v1272_v55 }
 0x139   : > { %v1275_v56 = vsub.f32 %v1956_v8, %v1274_v37  ;;  %v1276_v57 = vsub.f32 %v1954_v1, %v1274_v37  ;;  %v1277_v14 = vsub.f32 %v1958_v12, %v1274_v37  ;;  %v1278_v29 = vsub.f32 %v1962_v4, %v1274_v37 }
 0x13a   : > { %v1279_v58 = vsub.f32 %v1969_v22, %v1274_v37  ;;  %v1280_v61 = vsub.f32 %v1973_v26, %v1274_v37  ;;  %v1281_v2 = vsub.f32 %v1977_v31, %v1274_v37  ;;  %v1282_v18 = vsub.f32 %v1983_v43, %v1274_v37 }
 0x13b   : > { %v1283_v45 = vmul.f32 %v1275_v56, %v1275_v56  ;;  %v1284_v59 = vmul.f32 %v1276_v57, %v1276_v57  ;;  %v1285_v60 = vmul.f32 %v1277_v14, %v1277_v14  ;;  %v1286_v54 = vmul.f32 %v1278_v29, %v1278_v29 }
 0x13c   : > { %v1287_v3 = vmul.f32 %v1279_v58, %v1279_v58  ;;  %v1288_v7 = vmul.f32 %v1280_v61, %v1280_v61  ;;  %v1289_v46 = vmul.f32 %v1281_v2, %v1281_v2  ;;  %v1290_v17 = vmul.f32 %v1282_v18, %v1282_v18 }
 0x13d   : > { %v1291_v62 = vsel %vm1251_vm5, %v1283_v45, 0.0  ;;  %v1292_v63 = vsel %vm1251_vm5, %v1284_v59, 0.0  ;;  %v1294_v5 = vsel %vm1251_vm5, %v1285_v60, 0.0  ;;  %v1296_v10 = vsel %vm1251_vm5, %v1286_v54, 0.0 }
 0x13e   : > { %v1293_v0 = vadd.f32 %v1292_v63, %v1291_v62  ;;  %v1298_v15 = vsel %vm1251_vm5, %v1287_v3, 0.0  ;;  %v1300_v19 = vsel %vm1251_vm5, %v1288_v7, 0.0  ;;  %v1302_v20 = vsel %vm1251_vm5, %v1289_v46, 0.0 }
 0x13f   : > { %v1304_v23 = vsel %vm1251_vm5, %v1290_v17, 0.0  ;;  %v1325_v42 = vsub.f32 0.0, %v1274_v37 }
 0x140   : > { %v1295_v6 = vadd.f32 %v1294_v5, %v1293_v0 }
 0x142   : > { %v1297_v13 = vadd.f32 %v1296_v10, %v1295_v6 }
 0x144   : > { %v1299_v16 = vadd.f32 %v1298_v15, %v1297_v13 }
 0x146   : > { %v1301_v11 = vadd.f32 %v1300_v19, %v1299_v16 }
 0x148   : > { %v1303_v21 = vadd.f32 %v1302_v20, %v1301_v11 }
 0x14a   : > { %v1305_v24 = vadd.f32 %v1304_v23, %v1303_v21 }
 0x14c   : > { %v1306_v25 = vrot.slane %v1305_v24, 4 }
 0x14e   : > { %v1307_v27 = vadd.f32 %v1306_v25, %v1305_v24 }
 0x150   : > { %v1308_v28 = vrot.slane %v1307_v27, 2 }
 0x152   : > { %v1309_v30 = vadd.f32 %v1308_v28, %v1307_v27 }
 0x154   : > { %v1310_v9 = vrot.slane %v1309_v30, 1 }
 0x156   : > { %v1311_v32 = vadd.f32 %v1310_v9, %v1309_v30 }
 0x158   : > { %v1313_v33 = vmul.f32 0.015625, %v1311_v32 }
 0x15a   : > { %v1314_v34 = vadd.f32 1e-05, %v1313_v33 }
 0x15c   : > { %1674 = vrsqrt.f32 %v1314_v34  ;;  %vm1321_vm7 = vweird.f32 %v1314_v34 }
 0x162   : > { %v1675_v35 = vpop.eup %1674 }
 0x163   : > { %v1316_v36 = vmul.f32 %v1675_v35, %v1314_v34  ;;  %vm1322_vm6 = vweird.f32 %v1675_v35 }
 0x164   : > { %vm1323_vm8 = vmor %vm1321_vm7, %vm1322_vm6 }
 0x165   : > { %v1317_v38 = vmul.f32 %v1675_v35, %v1316_v36 }
 0x167   : > { %v1318_v39 = vmul.f32 0.5, %v1317_v38 }
 0x169   : > { %v1319_v40 = vsub.f32 1.5, %v1318_v39 }
 0x16b   : > { %v1320_v41 = vmul.f32 %v1675_v35, %v1319_v40 }
 0x16d   : > { %v1324_v44 = vsel %vm1323_vm8, %v1675_v35, %v1320_v41 }
 0x16e   : > { %v1326_v47 = vmul.f32 %v1325_v42, %v1324_v44  ;;  %v1327_v48 = vmul.f32 %v1324_v44, %v1956_v8  ;;  %v1328_v49 = vmul.f32 %v1324_v44, %v1954_v1  ;;  %v1329_v50 = vmul.f32 %v1324_v44, %v1958_v12 }
 0x16f   : > { %v1330_v51 = vmul.f32 %v1324_v44, %v1962_v4  ;;  %v1331_v52 = vmul.f32 %v1324_v44, %v1969_v22  ;;  %v1332_v53 = vmul.f32 %v1324_v44, %v1973_v26  ;;  %v1333_v55 = vmul.f32 %v1324_v44, %v1977_v31 }
 0x170   : > { %v1334_v56 = vmul.f32 %v1324_v44, %v1983_v43  ;;  %v1335_v37 = vadd.f32 %v1327_v48, %v1326_v47  ;;  %v1336_v57 = vadd.f32 %v1328_v49, %v1326_v47  ;;  %v1337_v14 = vadd.f32 %v1329_v50, %v1326_v47 }
 0x171   : > { %v1338_v1 = vadd.f32 %v1330_v51, %v1326_v47  ;;  %v1339_v8 = vadd.f32 %v1331_v52, %v1326_v47  ;;  %v1340_v12 = vadd.f32 %v1332_v53, %v1326_v47  ;;  %v1341_v29 = vadd.f32 %v1333_v55, %v1326_v47 }
 0x172   : > { %v1343_v4 = vmax.f32 %v1335_v37, 0.0  ;;  %v1344_v58 = vmax.f32 %v1336_v57, 0.0  ;;  %v1345_v22 = vmax.f32 %v1337_v14, 0.0  ;;  %v1342_v45 = vadd.f32 %v1334_v56, %v1326_v47 }
 0x173   : > { %v1346_v26 = vmax.f32 %v1338_v1, 0.0  ;;  %v1347_v59 = vmax.f32 %v1339_v8, 0.0  ;;  %v1348_v31 = vmax.f32 %v1340_v12, 0.0  ;;  %v1349_v43 = vmax.f32 %v1341_v29, 0.0 }
 0x174   : > { %1351 = vst.msk [vmem:[%s170_s15] sm:$0xff] %vm1251_vm5, %v1343_v4  ;;  %v1350_v60 = vmax.f32 %v1342_v45, 0.0 }
 0x175   : > { %1352 = vst.msk [vmem:[%s170_s15 + $0x8] sm:$0xff] %vm1251_vm5, %v1344_v58 }
 0x176   : > { %1353 = vst.msk [vmem:[%s170_s15 + $0x10] sm:$0xff] %vm1251_vm5, %v1345_v22 }
 0x177   : > { %1354 = vst.msk [vmem:[%s170_s15 + $0x18] sm:$0xff] %vm1251_vm5, %v1346_v26 }
 0x178   : > { %1355 = vst.msk [vmem:[%s170_s15 + $0x20] sm:$0xff] %vm1251_vm5, %v1347_v59 }
 0x179   : > { %1356 = vst.msk [vmem:[%s170_s15 + $0x28] sm:$0xff] %vm1251_vm5, %v1348_v31 }
 0x17a   : > { %1357 = vst.msk [vmem:[%s170_s15 + $0x30] sm:$0xff] %vm1251_vm5, %v1349_v43 }
 0x17b   : > { %1358 = vst.msk [vmem:[%s170_s15 + $0x38] sm:$0xff] %vm1251_vm5, %v1350_v60 }
 0x17c PF: > { %s13_s12 = sadd.s32 1, %s1682_s12  }
 0x17d   : > { %p10_p4 = scmp.ge.s32.totalorder %s13_s12, 4  }
 0x17f   :  { %12 = sbr.rel (!%p10_p4) target bundleno = 1 (0x1), region = 75 }

</bundles_post_ra>
